<compile_context>
chip_gen: v6e
topology: v6e:2x2x1
jax: 0.10.0
libtpu: 0.0.40
codegen_flags: <defaults>
</compile_context>

<pallas_src>
import math

import jax
import jax.numpy as jnp
from jax.experimental import pallas as pl
from jax.experimental.pallas import tpu as pltpu


def _scale_rows_kernel(x_ref, w_ref, o_ref):
    # x_ref: (tile_r, C), w_ref: (1, C) precomputed normalized weights.
    # Single fused elementwise multiply per vreg; (1, C) broadcasts over rows.
    o_ref[...] = x_ref[...] * w_ref[...]


def _chip_params():
    """Per-generation VMEM budget / grid semantics for this mem-bound kernel."""
    kind = ""
    try:
        kind = jax.devices()[0].device_kind.lower()
    except Exception:
        pass
    if "v7" in kind:
        # ~8 MiB input tiles (~32 MiB resident, double-buffered in+out);
        # v7x default scoped VMEM is 32 MiB so raise the limit explicitly.
        return {"budget": 32 << 20, "vmem_limit": 48 << 20,
                "semantics": pltpu.CORE_PARALLEL}
    if "v6" in kind:
        # ~6 MiB tiles; 24 MiB resident stays under v6e's 32 MiB default.
        return {"budget": 24 << 20, "vmem_limit": None, "semantics": "parallel"}
    # v5e (16 MiB default scoped VMEM) and anything unknown: stay conservative.
    return {"budget": 14 << 20, "vmem_limit": None, "semantics": "parallel"}


def _scale_rows(x2, w_row, params):
    """Run the streamed row-scaling kernel on a (n_rows, c) array."""
    n_rows, c = x2.shape
    itemsize = jnp.dtype(x2.dtype).itemsize
    sub = max(8, 32 // itemsize)          # sublane packing: 8 f32, 16 bf16, 32 i8
    bytes_per_row = c * itemsize
    # in + out tiles, double-buffered -> ~4x the tile bytes resident in VMEM.
    max_rows = max(sub, (params["budget"] // (4 * bytes_per_row)) // sub * sub)
    tile_r = n_rows if n_rows <= max_rows else max_rows
    grid = (pl.cdiv(n_rows, tile_r),)

    cp_kwargs = {"dimension_semantics": (params["semantics"],)}
    if params["vmem_limit"] is not None:
        cp_kwargs["vmem_limit_bytes"] = params["vmem_limit"]

    return pl.pallas_call(
        _scale_rows_kernel,
        out_shape=jax.ShapeDtypeStruct((n_rows, c), x2.dtype),
        grid_spec=pltpu.PrefetchScalarGridSpec(
            num_scalar_prefetch=0,
            grid=grid,
            in_specs=[
                pl.BlockSpec((tile_r, c), lambda i: (i, 0)),   # streamed x rows
                pl.BlockSpec((1, c), lambda i: (0, 0)),        # resident weights
            ],
            out_specs=pl.BlockSpec((tile_r, c), lambda i: (i, 0)),
        ),
        compiler_params=pltpu.CompilerParams(**cp_kwargs),
    )(x2, w_row)


def positional_encoding(x, weights):
    """x: (..., L) float, weights: (1, L) float.  Returns x * relu(w / max(w))."""
    L = weights.shape[-1]
    assert x.shape[-1] == L, "last dim of x must match weight length"
    orig_shape = x.shape

    # Hoisted weight normalization (done once, not per grid step).
    # NOTE: matches PyTorch semantics exactly, including Inf/NaN if max(w)==0.
    w_f = jnp.maximum(weights / jnp.max(weights), 0.0).reshape(1, L).astype(x.dtype)

    rows = 1
    for d in orig_shape[:-1]:
        rows *= d
    x2 = x.reshape(rows, L)

    params = _chip_params()

    # Lane-dense layout: fuse rows so the fused last dim is a multiple of 128.
    fuse = 128 // math.gcd(L, 128)
    fused_c = fuse * L
    use_fused = fuse > 1 and fused_c <= 65536 and rows >= fuse

    if not use_fused:
        # L already a multiple of 128 (fuse == 1) or too few rows to fuse.
        out2 = _scale_rows(x2, w_f, params)
        return out2.reshape(orig_shape)

    bulk_rows = (rows // fuse) * fuse
    tail_rows = rows - bulk_rows

    # Bulk: lane-dense fused path (unmasked 128-wide stores).
    w_fused = jnp.tile(w_f, (1, fuse))            # period-L pattern repeated
    x_bulk = x2[:bulk_rows].reshape(bulk_rows // fuse, fused_c)
    out_bulk = _scale_rows(x_bulk, w_fused, params).reshape(bulk_rows, L)

    if tail_rows == 0:
        return out_bulk.reshape(orig_shape)

    # Tail: < fuse leftover rows go through the L-lane fallback kernel only.
    out_tail = _scale_rows(x2[bulk_rows:], w_f, params)
    out2 = jnp.concatenate([out_bulk, out_tail], axis=0)
    return out2.reshape(orig_shape)


if __name__ == "__main__":
    LENGTH = 52
    key = jax.random.PRNGKey(0)
    k1, k2, k3, k4 = jax.random.split(key, 4)

    def ref_fn(x, w):
        w_f = jnp.maximum(w / jnp.max(w), 0.0)
        return x * w_f

    # Random positive weights exercise the normalization path.
    weights = jax.random.uniform(k2, (1, LENGTH), dtype=jnp.float32) + 0.5

    # Path 1: rows = 32, divisible by fuse=32 -> fully lane-dense fused path.
    x1 = jax.random.normal(k1, (4, 8, LENGTH), dtype=jnp.float32)
    out1 = jax.block_until_ready(positional_encoding(x1, weights))
    assert out1.shape == x1.shape and out1.dtype == x1.dtype
    assert jnp.allclose(out1, ref_fn(x1, weights), atol=1e-6, rtol=1e-6)

    # Path 2: rows = 35 -> 32 fused bulk rows + 3-row masked tail.
    x2 = jax.random.normal(k3, (5, 7, LENGTH), dtype=jnp.float32)
    out2 = jax.block_until_ready(positional_encoding(x2, weights))
    assert out2.shape == x2.shape and out2.dtype == x2.dtype
    assert jnp.allclose(out2, ref_fn(x2, weights), atol=1e-6, rtol=1e-6)

    # Path 3: rows = 14 < fuse -> pure fallback path.
    x3 = jax.random.normal(k4, (2, 7, LENGTH), dtype=jnp.float32)
    out3 = jax.block_until_ready(positional_encoding(x3, weights))
    assert out3.shape == x3.shape and out3.dtype == x3.dtype
    assert jnp.allclose(out3, ref_fn(x3, weights), atol=1e-6, rtol=1e-6)

    # Path 4: module's default init (all-ones weights) -> identity scaling.
    w_ones = jnp.ones((1, LENGTH), dtype=jnp.float32)
    out4 = jax.block_until_ready(positional_encoding(x1, w_ones))
    assert jnp.allclose(out4, ref_fn(x1, w_ones), atol=1e-6, rtol=1e-6)

    print("KERNEL_OK")
</pallas_src>

<mosaic_0001>
module attributes {stable_mosaic.version = 11 : i64} {
  func.func @_scale_rows_kernel(%arg0: i32, %arg1: memref<1x1664xf32, #tpu.memory_space<vmem>>, %arg2: memref<1x1664xf32, #tpu.memory_space<vmem>>, %arg3: memref<1x1664xf32, #tpu.memory_space<vmem>>) attributes {dimension_semantics = [#tpu.dimension_semantics<parallel>], iteration_bounds = array<i64: 1>, scalar_prefetch = 0 : i64, scratch_operands = 0 : i64, tpu.core_type = #tpu.core_type<tc>, window_params = [{transform_indices = @transform_0, window_bounds = array<i64: 1, 1664>}, {pipeline_mode = #tpu.pipeline_mode<synchronous>, transform_indices = @transform_1, window_bounds = array<i64: 1, 1664>}, {transform_indices = @transform_2, window_bounds = array<i64: 1, 1664>}]} {
    %c0 = arith.constant 0 : index
    %c0_0 = arith.constant 0 : index
    %0 = vector.load %arg1[%c0, %c0_0] : memref<1x1664xf32, #tpu.memory_space<vmem>>, vector<1x1664xf32>
    %c0_1 = arith.constant 0 : index
    %c0_2 = arith.constant 0 : index
    %1 = vector.load %arg2[%c0_1, %c0_2] : memref<1x1664xf32, #tpu.memory_space<vmem>>, vector<1x1664xf32>
    %2 = arith.mulf %0, %1 : vector<1x1664xf32>
    %c0_3 = arith.constant 0 : index
    %c0_4 = arith.constant 0 : index
    %3 = vector.load %arg3[%c0_3, %c0_4] : memref<1x1664xf32, #tpu.memory_space<vmem>>, vector<1x1664xf32>
    tpu.vector_store %arg3[%c0_3, %c0_4], %2 {strides = array<i32>} : memref<1x1664xf32, #tpu.memory_space<vmem>>, vector<1x1664xf32>,
    return
  }
  func.func @transform_0(%arg0: i32) -> (i32, i32) {
    %c0_i32 = arith.constant 0 : i32
    %c0_i32_0 = arith.constant 0 : i32
    return %arg0, %c0_i32 : i32, i32
  }
  func.func @transform_1(%arg0: i32) -> (i32, i32) {
    %c0_i32 = arith.constant 0 : i32
    %c0_i32_0 = arith.constant 0 : i32
    %c0_i32_1 = arith.constant 0 : i32
    return %c0_i32, %c0_i32_0 : i32, i32
  }
  func.func @transform_2(%arg0: i32) -> (i32, i32) {
    %c0_i32 = arith.constant 0 : i32
    %c0_i32_0 = arith.constant 0 : i32
    return %arg0, %c0_i32 : i32, i32
  }
}

</mosaic_0001>

<bundles_post_ra>
// kernel: tpu_custom_call.1
= control target key start
LH: loop header
LB: loop body
LE: loop exit
PB: predicated region body
PF: predicated region fallthrough
CT: control target
= control target key end

     0   :  { %7 = vsyncpa [#allocation3], 0  ;;  %s160_s0 = inlined_call_operand.hbm [shape: f32[1,1664], index: 0, kind: input, shape index: {}]   ;;  %s161_s1 = inlined_call_operand.hbm [shape: f32[1,1664], index: 1, kind: input, shape index: {}]   ;;  %s162_s2 = inlined_call_operand.hbm [shape: f32[1,1664], index: 2, kind: output, shape index: {}]  }
   0x1   :  { %8 = vsyncpa [#allocation6], 0 }
   0x2   :  { %9 = vsyncpa [#allocation4], 0  ;;  %s133_s9 = smov [#allocation2]   ;;  %s134_s11 = smov [#allocation5]  }
   0x3   :  { %s16_s10 = sshll.u32 %s133_s9, 4  ;;  %s26_s12 = sshll.u32 %s134_s11, 4  ;;  %s17_s10 = int_to_ptr.vmem [resolvable:$true] %s16_s10  ;;  %s27_s12 = int_to_ptr.vmem [resolvable:$true] %s26_s12 }
   0x4   :  { %s75_s13 = scalar_lea.vmem %s17_s10, 208  ;;  %s79_s14 = scalar_lea.vmem %s17_s10, 224 }
   0x5   :  { %p76_p0 = scmp.ne.s32.totalorder %s17_s10, %s75_s13  ;;  %p80_p1 = scmp.lt.s32.totalorder %s17_s10, %s17_s10 }
   0x6   :  { %p81_p2 = scmp.lt.s32.totalorder %s79_s14, %s75_s13 }
   0x8   :  { %p82_p3 = por %p81_p2, %p80_p1 }
   0xa   :  { %p83_p4 = pnand %p82_p3, %p76_p0 }
   0xc   :  { %86 = shalt.err (!%p83_p4)
}
   0xd   :  { %19 = dma.hbm_to_vmem [thread:$0]  %s160_s0, 208, %s17_s10, [#allocation3]  }
   0xe   :  { %s95_s17 = scalar_lea.vmem %s27_s12, 208  ;;  %s99_s18 = scalar_lea.vmem %s27_s12, 224 }
   0xf   :  { %p96_p5 = scmp.ne.s32.totalorder %s27_s12, %s95_s17  ;;  %p100_p6 = scmp.lt.s32.totalorder %s27_s12, %s27_s12 }
  0x10   :  { %p101_p7 = scmp.lt.s32.totalorder %s99_s18, %s95_s17 }
  0x12   :  { %p102_p8 = por %p101_p7, %p100_p6 }
  0x14   :  { %p103_p9 = pnand %p102_p8, %p96_p5 }
  0x16   :  { %106 = shalt.err (!%p103_p9)
}
  0x17   :  { %29 = dma.hbm_to_vmem [thread:$0]  %s161_s1, 208, %s27_s12, [#allocation6]  }
  0x18   :  { %127 = dma.done.wait [#allocation3], 208  }
  0x19   :  { %128 = vsyncadd [#allocation3], 4294967088 }
  0x1a   :  { %129 = dma.done.wait [#allocation6], 208  }
  0x1b   :  { %130 = vsyncadd [#allocation6], 4294967088  ;;  %v43_v0 = vlaneseq  ;;  %s135_s21 = smov [#allocation7]   ;;  %v36_v1 = vld [vmem:[#allocation2] sm:$0xff]  ;;  %v38_v2 = vld [vmem:[#allocation5] sm:$0xff] }
  0x1c   :  { %s54_s22 = sshll.u32 %s135_s21, 4  ;;  %v37_v3 = vld [vmem:[#allocation2 + $0x8] sm:$0x1f]  ;;  %v40_v4 = vmul.f32 %v38_v2, %v36_v1  ;;  %v39_v5 = vld [vmem:[#allocation5 + $0x8] sm:$0x1f]  ;;  %s55_s22 = int_to_ptr.vmem [resolvable:$true] %s54_s22 }
  0x1d   :  { %vm45_vm0 = vcmp.lt.s32.totalorder %v43_v0, 640  ;;  %v41_v6 = vmul.f32 %v39_v5, %v37_v3  ;;  %s107_s0 = scalar_lea.vmem %s55_s22, 208  ;;  %s111_s1 = scalar_lea.vmem %s55_s22, 224 }
  0x1e   :  { %42 = vst [vmem:[#allocation7] sm:$0xff] %v40_v4  ;;  %p108_p10 = scmp.ne.s32.totalorder %s55_s22, %s107_s0  ;;  %p112_p11 = scmp.lt.s32.totalorder %s55_s22, %s55_s22 }
  0x1f   :  { %47 = vst.msk [vmem:[#allocation7 + $0x8] sm:$0x1f] %vm45_vm0, %v41_v6  ;;  %p113_p12 = scmp.lt.s32.totalorder %s111_s1, %s107_s0 }
  0x21   :  { %p114_p13 = por %p113_p12, %p112_p11 }
  0x23   :  { %p115_p0 = pnand %p114_p13, %p108_p10 }
  0x25   :  { %118 = shalt.err (!%p115_p0)
}
  0x26   :  { %57 = dma.vmem_to_hbm [thread:$0]  %s55_s22, 208, %s162_s2, [#allocation4]  }
  0x27   :  { %131 = dma.done.wait [#allocation4], 208  }
  0x28   :  { %132 = vsyncadd [#allocation4], 4294967088 }
  0x29   :  { %61 = vsyncpa [#allocation3], 1 }
  0x2a   :  { %62 = vsyncpa [#allocation6], 1 }
  0x2b   :  { %63 = vsyncpa [#allocation4], 1 }

</bundles_post_ra>
